<compile_context>
chip_gen: v6e
topology: v6e:2x2x1
jax: 0.10.0
libtpu: 0.0.40
codegen_flags: <defaults>
</compile_context>

<pallas_src>
import math

import jax
import jax.numpy as jnp
from jax.experimental import pallas as pl
from jax.experimental.pallas import tpu as pltpu

INPUT_DIM = 106
HIDDEN_DIM = 32
OUTPUT_DIM = 1
LANES = 128


def _pick_block_rows(batch, requested):
    """Row-tile size: multiple of 128, >= 2 grid steps when possible, capped."""
    cap = max(LANES, (min(requested, 8192) // LANES) * LANES)
    if batch <= LANES:
        return LANES
    n_tiles = max(2, -(-batch // cap))          # >= 2 so v7x can use both TCs
    tb = -(-batch // n_tiles)                   # ceil(batch / n_tiles)
    tb = ((tb + LANES - 1) // LANES) * LANES    # lane-dense epilogue needs 128 | tb
    return min(tb, cap)


def _mlp_kernel(x_ref, w1_ref, b1_ref, w2_ref, b2_ref, o_ref):
    grp = o_ref.shape[0]          # number of 128-row panels in this tile
    hid = w1_ref.shape[1]

    # Layer 1 on the MXU (f32 accumulation); bias + ReLU on the VPU.
    h = jnp.dot(x_ref[...], w1_ref[...], preferred_element_type=jnp.float32)
    h = jnp.maximum(h + b1_ref[...], 0.0)                       # (tb, H) f32

    # Regroup rows into 128-lane panels (leading-dim split: layout preserving).
    h3 = h.reshape(grp, LANES, hid)                             # (G, 128, H)
    w2b = jnp.broadcast_to(w2_ref[...].reshape(1, 1, hid), (grp, 1, hid))

    # Layer 2 as a batched A @ B^T matmul -> lane-dense (G, 1, 128) logits.
    z = jnp.einsum('gph,glh->gpl', w2b, h3,
                   preferred_element_type=jnp.float32) + b2_ref[0]

    # Numerically stable sigmoid: exp -> EUP, approx reciprocal -> EUP.
    e = jnp.exp(-jnp.abs(z))
    p = jnp.where(z >= 0.0, 1.0, e) * pl.reciprocal(1.0 + e, approx=True)
    o_ref[...] = p.astype(o_ref.dtype)


def mlp_forward(x, w1, b1, w2, b2, *, block_rows=None):
    """Fused MLP forward.

    x:  [B, F]  activations (f32 or bf16), unpadded, F = 106
    w1: [F, H]  layer_1.weight transposed (ideally same storage dtype as x)
    b1: [1, H]  f32
    w2: [1, H]  layer_2.weight (PyTorch [out, in] layout), f32
    b2: [1]     f32
    Returns [B, 1] f32 probabilities.
    """
    B, F = x.shape
    Kw, H = w1.shape
    assert Kw == F
    assert b1.shape == (1, H) and w2.shape == (OUTPUT_DIM, H)
    assert b2.shape == (OUTPUT_DIM,)

    if block_rows is None:
        block_rows = 8192 if x.dtype.itemsize <= 2 else 4096
    tb = _pick_block_rows(B, block_rows)
    num_tiles = -(-B // tb)
    grp = tb // LANES

    cost = pl.CostEstimate(
        flops=2 * B * H * (F + 1),
        transcendentals=B,
        bytes_accessed=(B * F * x.dtype.itemsize
                        + F * H * w1.dtype.itemsize
                        + num_tiles * grp * LANES * 4),
    )

    out = pl.pallas_call(
        _mlp_kernel,
        out_shape=jax.ShapeDtypeStruct((num_tiles * grp, 1, LANES), jnp.float32),
        grid=(num_tiles,),
        in_specs=[
            pl.BlockSpec((tb, F), lambda i: (i, 0)),             # x tile (pipelined)
            pl.BlockSpec((Kw, H), lambda i: (0, 0)),             # w1, VMEM-resident
            pl.BlockSpec((1, H), lambda i: (0, 0)),              # b1, VMEM-resident
            pl.BlockSpec((1, H), lambda i: (0, 0)),              # w2 row, VMEM-resident
            pl.BlockSpec(memory_space=pltpu.MemorySpace.SMEM),   # b2 scalar
        ],
        out_specs=pl.BlockSpec((grp, 1, LANES), lambda i: (i, 0, 0)),
        compiler_params=pltpu.CompilerParams(
            dimension_semantics=("parallel",)),
        cost_estimate=cost,
    )(x, w1, b1, w2, b2)

    # (T*G, 1, 128) -> (T*G*128, 1); rows beyond B come from the clipped
    # partial last block (ghost rows) and are dropped here.
    return out.reshape(-1, 1)[:B]


def init_params(key, input_dim=INPUT_DIM, hidden_dim=HIDDEN_DIM,
                output_dim=OUTPUT_DIM):
    """Mirror the PyTorch module's __init__ (f32 master params).

    layer_1.weight: kaiming_uniform_(nonlinearity='relu') -> U(-b, b) with
      b = sqrt(2) * sqrt(3 / fan_in), fan_in = input_dim.
    layer_1.bias / layer_2.{weight,bias}: U(-1/sqrt(fan_in), 1/sqrt(fan_in)).
    w1 is stored transposed ([in, out]); w2 keeps the PyTorch [out, in] layout.
    """
    k1, k2, k3, k4 = jax.random.split(key, 4)
    bw1 = math.sqrt(2.0) * math.sqrt(3.0 / input_dim)
    w1 = jax.random.uniform(k1, (input_dim, hidden_dim), jnp.float32, -bw1, bw1)
    bb1 = 1.0 / math.sqrt(input_dim)
    b1 = jax.random.uniform(k2, (1, hidden_dim), jnp.float32, -bb1, bb1)
    b2nd = 1.0 / math.sqrt(hidden_dim)
    w2 = jax.random.uniform(k3, (output_dim, hidden_dim), jnp.float32, -b2nd, b2nd)
    b2 = jax.random.uniform(k4, (output_dim,), jnp.float32, -b2nd, b2nd)
    return w1, b1, w2, b2


def reference_forward(x, w1, b1, w2, b2):
    h = jnp.maximum(x.astype(jnp.float32) @ w1.astype(jnp.float32) + b1, 0.0)
    return jax.nn.sigmoid(h @ w2.T.astype(jnp.float32) + b2)


if __name__ == "__main__":
    key = jax.random.PRNGKey(0)
    k_params, k_x1, k_x2 = jax.random.split(key, 3)

    w1, b1, w2, b2 = init_params(k_params)   # f32 master params

    # Small batch: single tile, clipped partial block (rows 8..127 are ghosts).
    batch = 8
    x = jax.random.normal(k_x1, (batch, INPUT_DIM), jnp.float32)
    ref = reference_forward(x, w1, b1, w2, b2)

    out = jax.block_until_ready(mlp_forward(x, w1, b1, w2, b2))
    assert out.shape == (batch, OUTPUT_DIM)
    assert jnp.allclose(out, ref, atol=5e-3, rtol=5e-3), "f32 path mismatch"

    # bf16 storage path (recommended serving default on all generations:
    # halves x HBM traffic; accumulation and epilogue stay f32).
    out_bf16 = jax.block_until_ready(
        mlp_forward(x.astype(jnp.bfloat16), w1.astype(jnp.bfloat16), b1, w2, b2))
    assert out_bf16.shape == (batch, OUTPUT_DIM)
    assert jnp.allclose(out_bf16, ref, atol=3e-2, rtol=3e-2), "bf16 path mismatch"

    # Multi-tile path: grid of 2 with a batch remainder in the last block.
    batch2 = 300
    x2 = jax.random.normal(k_x2, (batch2, INPUT_DIM), jnp.float32)
    ref2 = reference_forward(x2, w1, b1, w2, b2)
    out2 = jax.block_until_ready(
        mlp_forward(x2, w1, b1, w2, b2, block_rows=256))
    assert out2.shape == (batch2, OUTPUT_DIM)
    assert jnp.allclose(out2, ref2, atol=5e-3, rtol=5e-3), "multi-tile mismatch"

    print("KERNEL_OK")
</pallas_src>

<mosaic_0001>
module attributes {stable_mosaic.version = 11 : i64} {
  func.func @_mlp_kernel(%arg0: i32, %arg1: memref<128x106xf32, #tpu.memory_space<vmem>>, %arg2: memref<106x32xf32, #tpu.memory_space<vmem>>, %arg3: memref<1x32xf32, #tpu.memory_space<vmem>>, %arg4: memref<1x32xf32, #tpu.memory_space<vmem>>, %arg5: memref<1xf32, #tpu.memory_space<smem>>, %arg6: memref<1x1x128xf32, #tpu.memory_space<vmem>>) attributes {dimension_semantics = [#tpu.dimension_semantics<parallel>], iteration_bounds = array<i64: 1>, scalar_prefetch = 0 : i64, scratch_operands = 0 : i64, tpu.core_type = #tpu.core_type<tc>, window_params = [{transform_indices = @transform_0, window_bounds = array<i64: 128, 106>}, {pipeline_mode = #tpu.pipeline_mode<synchronous>, transform_indices = @transform_1, window_bounds = array<i64: 106, 32>}, {pipeline_mode = #tpu.pipeline_mode<synchronous>, transform_indices = @transform_2, window_bounds = array<i64: 1, 32>}, {pipeline_mode = #tpu.pipeline_mode<synchronous>, transform_indices = @transform_3, window_bounds = array<i64: 1, 32>}, {transform_indices = @transform_4, window_bounds = array<i64: 1>}, {transform_indices = @transform_5, window_bounds = array<i64: 1, 1, 128>}]} {
    %c0 = arith.constant 0 : index
    %c0_0 = arith.constant 0 : index
    %0 = vector.load %arg1[%c0, %c0_0] : memref<128x106xf32, #tpu.memory_space<vmem>>, vector<128x106xf32>
    %c0_1 = arith.constant 0 : index
    %c0_2 = arith.constant 0 : index
    %1 = vector.load %arg2[%c0_1, %c0_2] : memref<106x32xf32, #tpu.memory_space<vmem>>, vector<106x32xf32>
    %cst = arith.constant dense<0.000000e+00> : vector<128x32xf32>
    %2 = tpu.matmul %0, %1, %cst {dimension_numbers = #tpu.dot_dimension_numbers<[1], [0], [0], [1], [0, 0, 1, 1], [], []>} : vector<128x106xf32>, vector<106x32xf32>, vector<128x32xf32> -> vector<128x32xf32>
    %c0_3 = arith.constant 0 : index
    %c0_4 = arith.constant 0 : index
    %3 = vector.load %arg3[%c0_3, %c0_4] : memref<1x32xf32, #tpu.memory_space<vmem>>, vector<1x32xf32>
    %4 = vector.broadcast %3 : vector<1x32xf32> to vector<128x32xf32>
    %5 = arith.addf %2, %4 : vector<128x32xf32>
    %cst_5 = arith.constant 0.000000e+00 : f32
    %6 = vector.broadcast %cst_5 : f32 to vector<128x32xf32>
    %7 = arith.maximumf %5, %6 : vector<128x32xf32>
    %8 = vector.shape_cast %7 : vector<128x32xf32> to vector<1x128x32xf32>
    %c0_6 = arith.constant 0 : index
    %c0_7 = arith.constant 0 : index
    %9 = vector.load %arg4[%c0_6, %c0_7] : memref<1x32xf32, #tpu.memory_space<vmem>>, vector<1x32xf32>
    %10 = vector.shape_cast %9 : vector<1x32xf32> to vector<1x1x32xf32>
    "tpu.trace_start"() <{level = 10 : i32, message = "gph,glh->gpl"}> : () -> ()
    %cst_8 = arith.constant dense<0.000000e+00> : vector<1x1x128xf32>
    %11 = tpu.matmul %10, %8, %cst_8 {dimension_numbers = #tpu.dot_dimension_numbers<[2], [2], [1], [1], [0, 0, 0, 1, 1, 1], [0], [0]>} : vector<1x1x32xf32>, vector<1x128x32xf32>, vector<1x1x128xf32> -> vector<1x1x128xf32>
    "tpu.trace_stop"() : () -> ()
    %c0_9 = arith.constant 0 : index
    %12 = memref.load %arg5[%c0_9] : memref<1xf32, #tpu.memory_space<smem>>
    %13 = vector.broadcast %12 : f32 to vector<1x1x128xf32>
    %14 = arith.addf %11, %13 : vector<1x1x128xf32>
    %15 = math.absf %14 : vector<1x1x128xf32>
    %cst_10 = arith.constant 0.000000e+00 : f32
    %16 = vector.broadcast %cst_10 : f32 to vector<1x1x128xf32>
    %17 = arith.subf %16, %15 : vector<1x1x128xf32>
    %18 = math.exp %17 : vector<1x1x128xf32>
    %cst_11 = arith.constant 0.000000e+00 : f32
    %19 = vector.broadcast %cst_11 : f32 to vector<1x1x128xf32>
    %20 = arith.cmpf oge, %14, %19 : vector<1x1x128xf32>
    %cst_12 = arith.constant 1.000000e+00 : f32
    %21 = vector.broadcast %cst_12 : f32 to vector<1x1x128xf32>
    %22 = arith.select %20, %21, %18 : vector<1x1x128xi1>, vector<1x1x128xf32>
    %cst_13 = arith.constant 1.000000e+00 : f32
    %23 = vector.broadcast %cst_13 : f32 to vector<1x1x128xf32>
    %24 = arith.addf %23, %18 : vector<1x1x128xf32>
    %25 = tpu.reciprocal %24 {approx = true} : vector<1x1x128xf32> -> vector<1x1x128xf32>
    %26 = arith.mulf %22, %25 : vector<1x1x128xf32>
    %c0_14 = arith.constant 0 : index
    %c0_15 = arith.constant 0 : index
    %c0_16 = arith.constant 0 : index
    %27 = vector.load %arg6[%c0_14, %c0_15, %c0_16] : memref<1x1x128xf32, #tpu.memory_space<vmem>>, vector<1x1x128xf32>
    tpu.vector_store %arg6[%c0_14, %c0_15, %c0_16], %26 {strides = array<i32>} : memref<1x1x128xf32, #tpu.memory_space<vmem>>, vector<1x1x128xf32>,
    return
  }
  func.func @transform_0(%arg0: i32) -> (i32, i32) {
    %c0_i32 = arith.constant 0 : i32
    %c0_i32_0 = arith.constant 0 : i32
    return %arg0, %c0_i32 : i32, i32
  }
  func.func @transform_1(%arg0: i32) -> (i32, i32) {
    %c0_i32 = arith.constant 0 : i32
    %c0_i32_0 = arith.constant 0 : i32
    %c0_i32_1 = arith.constant 0 : i32
    return %c0_i32, %c0_i32_0 : i32, i32
  }
  func.func @transform_2(%arg0: i32) -> (i32, i32) {
    %c0_i32 = arith.constant 0 : i32
    %c0_i32_0 = arith.constant 0 : i32
    %c0_i32_1 = arith.constant 0 : i32
    return %c0_i32, %c0_i32_0 : i32, i32
  }
  func.func @transform_3(%arg0: i32) -> (i32, i32) {
    %c0_i32 = arith.constant 0 : i32
    %c0_i32_0 = arith.constant 0 : i32
    %c0_i32_1 = arith.constant 0 : i32
    return %c0_i32, %c0_i32_0 : i32, i32
  }
  func.func @transform_4(%arg0: i32) -> i32 {
    %c0_i32 = arith.constant 0 : i32
    %c0_i32_0 = arith.constant 0 : i32
    return %c0_i32 : i32
  }
  func.func @transform_5(%arg0: i32) -> (i32, i32, i32) {
    %c0_i32 = arith.constant 0 : i32
    %c0_i32_0 = arith.constant 0 : i32
    %c0_i32_1 = arith.constant 0 : i32
    return %arg0, %c0_i32, %c0_i32_0 : i32, i32, i32
  }
}

</mosaic_0001>

<bundles_post_ra>
// kernel: tpu_custom_call.1
= control target key start
LH: loop header
LB: loop body
LE: loop exit
PB: predicated region body
PF: predicated region fallthrough
CT: control target
= control target key end

     0   :  { %vm108_vm0 = vcmask 1041408   ;;  %vm59_vm1 = vcmask 867328   ;;  %s814_s0 = inlined_call_operand.vmem [shape: f32[8,106], index: 0, kind: input, shape index: {}]   ;;  %s815_s1 = inlined_call_operand.vmem [shape: f32[106,32], index: 1, kind: input, shape index: {}]   ;;  %s816_s2 = inlined_call_operand.vmem [shape: f32[1,32], index: 2, kind: input, shape index: {}]   ;;  %s817_s3 = inlined_call_operand.vmem [shape: f32[1,32], index: 3, kind: input, shape index: {}]   ;;  %s818_s4 = inlined_call_operand.<no memory space> [shape: f32[1], index: 4, kind: input, shape index: {}]   ;;  %s819_s5 = inlined_call_operand.hbm [shape: f32[1,1,128], index: 5, kind: output, shape index: {}]  }
   0x1   :  { %v51_v0 = vld [vmem:[%s815_s1 + $0x68] sm:$0x3]  ;;  %v50_v1 = vld [vmem:[%s815_s1 + $0x60] sm:$0xff]  ;;  %v49_v2 = vld [vmem:[%s815_s1 + $0x58] sm:$0xff] }
   0x2   :  { %504 = vmatprep.subr.msk.mxu0 %vm108_vm0, %v51_v0  ;;  %v48_v3 = vld [vmem:[%s815_s1 + $0x50] sm:$0xff]  ;;  %v22_v4 = vld [vmem:[%s814_s0] sm:$0xff]  ;;  %v47_v5 = vld [vmem:[%s815_s1 + $0x48] sm:$0xff] }
   0x3   :  { %505 = vmatpush3.msk.msra.mxu0 %vm108_vm0, %v51_v0  ;;  %532 = vmatprep.mubr.msk.f32.mxu0 %vm59_vm1, %v22_v4  ;;  %v46_v6 = vld [vmem:[%s815_s1 + $0x40] sm:$0xff]  ;;  %v45_v7 = vld [vmem:[%s815_s1 + $0x38] sm:$0xff] }
   0x4   :  { %506 = vmatprep.subr.mxu0 %v50_v1 }
   0x5   :  { %507 = vmatpush3.msra.mxu0 %v50_v1 }
   0x6   :  { %508 = vmatprep.subr.mxu0 %v49_v2 }
   0x7   :  { %509 = vmatpush3.msra.mxu0 %v49_v2 }
   0x8   :  { %510 = vmatprep.subr.mxu0 %v48_v3 }
   0x9   :  { %511 = vmatpush3.msra.mxu0 %v48_v3 }
   0xa   :  { %512 = vmatprep.subr.mxu0 %v47_v5 }
   0xb   :  { %513 = vmatpush3.msra.mxu0 %v47_v5 }
   0xc   :  { %11 = vsyncpa [#allocation4], 0  ;;  %514 = vmatprep.subr.mxu0 %v46_v6  ;;  %v44_v8 = vld [vmem:[%s815_s1 + $0x30] sm:$0xff]  ;;  %v43_v9 = vld [vmem:[%s815_s1 + $0x28] sm:$0xff]  ;;  %v620_v30 = vmov 0.0   ;;  %vm621_vm2 = vmmov 0  }
   0xd   :  { %515 = vmatpush3.msra.mxu0 %v46_v6  ;;  %v42_v10 = vld [vmem:[%s815_s1 + $0x20] sm:$0xff]  ;;  %v41_v11 = vld [vmem:[%s815_s1 + $0x18] sm:$0xff]  ;;  %v40_v12 = vld [vmem:[%s815_s1 + $0x10] sm:$0xff]  ;;  %556 = vmatprep.subr.mxu1 %v620_v30  ;;  %vm276_vm3 = vcmask 261120   ;;  %s622_s30 = smov [#allocation3]  }
   0xe   :  { %516 = vmatprep.subr.mxu0 %v45_v7  ;;  %v39_v13 = vld [vmem:[%s815_s1 + $0x8] sm:$0xff]  ;;  %v38_v14 = vld [vmem:[%s815_s1] sm:$0xff]  ;;  %v24_v16 = vld [vmem:[%s814_s0 + $0x10] sm:$0xff]  ;;  %588 = vmatprep.mubr.msk.f32.mxu1 %vm621_vm2, %v620_v30  ;;  %s414_s6 = sshll.u32 %s622_s30, 4  ;;  %s415_s6 = int_to_ptr.vmem [resolvable:$true] %s414_s6 }
   0xf   :  { %517 = vmatpush3.msra.mxu0 %v45_v7  ;;  %v23_v15 = vld [vmem:[%s814_s0 + $0x8] sm:$0xff]  ;;  %v25_v17 = vld [vmem:[%s814_s0 + $0x18] sm:$0xff]  ;;  %v26_v18 = vld [vmem:[%s814_s0 + $0x20] sm:$0xff]  ;;  %p603_p1 = scmp.lt.s32.totalorder %s415_s6, %s415_s6 }
  0x10   :  { %518 = vmatprep.subr.mxu0 %v44_v8  ;;  %v27_v19 = vld [vmem:[%s814_s0 + $0x28] sm:$0xff]  ;;  %v28_v20 = vld [vmem:[%s814_s0 + $0x30] sm:$0xff]  ;;  %v29_v21 = vld [vmem:[%s814_s0 + $0x38] sm:$0xff] }
  0x11   :  { %519 = vmatpush3.msra.mxu0 %v44_v8  ;;  %v30_v22 = vld [vmem:[%s814_s0 + $0x40] sm:$0xff]  ;;  %v31_v23 = vld [vmem:[%s814_s0 + $0x48] sm:$0xff]  ;;  %v32_v24 = vld [vmem:[%s814_s0 + $0x50] sm:$0xff] }
  0x12   :  { %520 = vmatprep.subr.mxu0 %v43_v9  ;;  %v33_v25 = vld [vmem:[%s814_s0 + $0x58] sm:$0xff]  ;;  %v34_v26 = vld [vmem:[%s814_s0 + $0x60] sm:$0xff]  ;;  %v35_v27 = vld [vmem:[%s814_s0 + $0x68] sm:$0xff] }
  0x13   :  { %521 = vmatpush3.msra.mxu0 %v43_v9  ;;  %v36_v28 = vld [vmem:[%s814_s0 + $0x70] sm:$0xff]  ;;  %v37_v29 = vld [vmem:[%s814_s0 + $0x78] sm:$0xff]  ;;  %v422_v45 = vld [vmem:[%s816_s2] ss:$0 sm:$0xff] }
  0x14   :  { %522 = vmatprep.subr.mxu0 %v42_v10 }
  0x15   :  { %523 = vmatpush3.msra.mxu0 %v42_v10 }
  0x16   :  { %524 = vmatprep.subr.mxu0 %v41_v11 }
  0x17   :  { %525 = vmatpush3.msra.mxu0 %v41_v11 }
  0x18   :  { %526 = vmatprep.subr.mxu0 %v40_v12 }
  0x19   :  { %527 = vmatpush3.msra.mxu0 %v40_v12 }
  0x1a   :  { %528 = vmatprep.subr.mxu0 %v39_v13 }
  0x1b   :  { %529 = vmatpush3.msra.mxu0 %v39_v13 }
  0x1c   :  { %530 = vmatprep.subr.mxu0 %v38_v14 }
  0x1d   :  { %531 = vmatpush3.msra.mxu0 %v38_v14 }
  0x1e   :  { %533 = vmatmul.mubr.msk.f32.vlgmr.msra.gmra.mxu0 %vm59_vm1, %v23_v15 }
  0x1f   :  { %535 = vmatprep.mubr.msk.f32.mxu0 %vm59_vm1, %v24_v16  ;;  %v273_v16 = vld [vmem:[%s817_s3] sm:$0x1]  ;;  %s598_s3 = scalar_lea.vmem %s415_s6, 16 }
  0x20   :  { %p599_p0 = scmp.ne.s32.totalorder %s415_s6, %s598_s3 }
  0x22   :  { %536 = vmatmul.mubr.msk.f32.gmra.mxu0 %vm59_vm1, %v25_v17  ;;  %v275_v17 = vstv %s818_s4  ;;  %s602_s4 = scalar_lea.vmem %s415_s6, 32 }
  0x23   :  { %538 = vmatprep.mubr.msk.f32.mxu0 %vm59_vm1, %v26_v18  ;;  %p604_p2 = scmp.lt.s32.totalorder %s602_s4, %s598_s3 }
  0x25   :  { %p605_p3 = por %p604_p2, %p603_p1 }
  0x26   :  { %539 = vmatmul.mubr.msk.f32.gmra.mxu0 %vm59_vm1, %v27_v19 }
  0x27   :  { %541 = vmatprep.mubr.msk.f32.mxu0 %vm59_vm1, %v28_v20  ;;  %p606_p4 = pnand %p605_p3, %p599_p0 }
  0x2a   :  { %542 = vmatmul.mubr.msk.f32.gmra.mxu0 %vm59_vm1, %v29_v21 }
  0x2b   :  { %544 = vmatprep.mubr.msk.f32.mxu0 %vm59_vm1, %v30_v22 }
  0x2e   :  { %545 = vmatmul.mubr.msk.f32.gmra.mxu0 %vm59_vm1, %v31_v23 }
  0x2f   :  { %547 = vmatprep.mubr.msk.f32.mxu0 %vm59_vm1, %v32_v24 }
  0x32   :  { %548 = vmatmul.mubr.msk.f32.gmra.mxu0 %vm59_vm1, %v33_v25 }
  0x33   :  { %550 = vmatprep.mubr.msk.f32.mxu0 %vm59_vm1, %v34_v26 }
  0x36   :  { %551 = vmatmul.mubr.msk.f32.gmra.mxu0 %vm59_vm1, %v35_v27 }
  0x37   :  { %553 = vmatprep.mubr.msk.f32.mxu0 %vm59_vm1, %v36_v28 }
  0x3a   :  { %554 = vmatmul.mubr.msk.f32.gmra.mxu0 %vm59_vm1, %v37_v29 }
  0xde   :  { %v761_v31 = vpop.f32.mrf.mxu0 }
  0xdf   :  { %v184_v11 = vadd.f32 %v761_v31, %v422_v45 }
  0xe0   :  { %v763_v32 = vpop.f32.mrf.mxu0 }
  0xe1   :  { %v258_v13 = vmax.f32 %v184_v11, 0.0  ;;  %v179_v14 = vadd.f32 %v422_v45, %v763_v32 }
  0xe2   :  { %v537_v33 = vpop.f32.mrf.mxu0 }
  0xe3   :  { %v194_v7 = vadd.f32 %v537_v33, %v422_v45  ;;  %v257_v15 = vmax.f32 %v179_v14, 0.0 }
  0xe4   :  { %v765_v34 = vpop.f32.mrf.mxu0 }
  0xe5   :  { %v260_v9 = vmax.f32 %v194_v7, 0.0  ;;  %v189_v10 = vadd.f32 %v422_v45, %v765_v34 }
  0xe6   :  { %v540_v35 = vpop.f32.mrf.mxu0 }
  0xe7   :  { %v204_v3 = vadd.f32 %v540_v35, %v422_v45  ;;  %v259_v12 = vmax.f32 %v189_v10, 0.0 }
  0xe8   :  { %v198_v36 = vpop.f32.mrf.mxu0 }
  0xe9   :  { %v262_v5 = vmax.f32 %v204_v3, 0.0  ;;  %v199_v6 = vadd.f32 %v422_v45, %v198_v36 }
  0xea   :  { %v543_v37 = vpop.f32.mrf.mxu0 }
  0xeb   :  { %v214_v63 = vadd.f32 %v543_v37, %v422_v45  ;;  %v261_v8 = vmax.f32 %v199_v6, 0.0 }
  0xec   :  { %v208_v38 = vpop.f32.mrf.mxu0 }
  0xed   :  { %v264_v1 = vmax.f32 %v214_v63, 0.0  ;;  %v209_v2 = vadd.f32 %v422_v45, %v208_v38 }
  0xee   :  { %v546_v39 = vpop.f32.mrf.mxu0 }
  0xef   :  { %v224_v59 = vadd.f32 %v546_v39, %v422_v45  ;;  %v263_v4 = vmax.f32 %v209_v2, 0.0 }
  0xf0   :  { %v218_v40 = vpop.f32.mrf.mxu0 }
  0xf1   :  { %v266_v61 = vmax.f32 %v224_v59, 0.0  ;;  %v219_v62 = vadd.f32 %v422_v45, %v218_v40 }
  0xf2   :  { %v549_v41 = vpop.f32.mrf.mxu0 }
  0xf3   :  { %v234_v55 = vadd.f32 %v549_v41, %v422_v45  ;;  %v265_v0 = vmax.f32 %v219_v62, 0.0 }
  0xf4   :  { %v228_v42 = vpop.f32.mrf.mxu0 }
  0xf5   :  { %v268_v57 = vmax.f32 %v234_v55, 0.0  ;;  %v229_v58 = vadd.f32 %v422_v45, %v228_v42 }
  0xf6   :  { %v552_v43 = vpop.f32.mrf.mxu0 }
  0xf7   :  { %v244_v51 = vadd.f32 %v552_v43, %v422_v45  ;;  %v267_v60 = vmax.f32 %v229_v58, 0.0 }
  0xf8   :  { %v238_v44 = vpop.f32.mrf.mxu0 }
  0xf9   :  { %v270_v53 = vmax.f32 %v244_v51, 0.0  ;;  %v239_v54 = vadd.f32 %v422_v45, %v238_v44 }
  0xfa   :  { %v555_v46 = vpop.f32.mrf.mxu0 }
  0xfb   :  { %v254_v47 = vadd.f32 %v555_v46, %v422_v45  ;;  %v269_v56 = vmax.f32 %v239_v54, 0.0 }
  0xfc   :  { %v248_v48 = vpop.f32.mrf.mxu0 }
  0xfd   :  { %v272_v49 = vmax.f32 %v254_v47, 0.0  ;;  %v249_v50 = vadd.f32 %v422_v45, %v248_v48 }
  0xff   :  { %557 = vmatpush3.xpose.msk.msra.mxu1 %vm276_vm3, %v272_v49  ;;  %v271_v52 = vmax.f32 %v249_v50, 0.0 }
 0x100   :  { %558 = vmatprep.subr.mxu1 %v620_v30 }
 0x103   :  { %559 = vmatpush3.xpose.msk.msra.mxu1 %vm276_vm3, %v271_v52 }
 0x104   :  { %560 = vmatprep.subr.mxu1 %v620_v30 }
 0x107   :  { %561 = vmatpush3.xpose.msk.msra.mxu1 %vm276_vm3, %v270_v53 }
 0x108   :  { %562 = vmatprep.subr.mxu1 %v620_v30 }
 0x10b   :  { %563 = vmatpush3.xpose.msk.msra.mxu1 %vm276_vm3, %v269_v56 }
 0x10c   :  { %564 = vmatprep.subr.mxu1 %v620_v30 }
 0x10f   :  { %565 = vmatpush3.xpose.msk.msra.mxu1 %vm276_vm3, %v268_v57 }
 0x110   :  { %566 = vmatprep.subr.mxu1 %v620_v30 }
 0x113   :  { %567 = vmatpush3.xpose.msk.msra.mxu1 %vm276_vm3, %v267_v60 }
 0x114   :  { %568 = vmatprep.subr.mxu1 %v620_v30 }
 0x117   :  { %569 = vmatpush3.xpose.msk.msra.mxu1 %vm276_vm3, %v266_v61 }
 0x118   :  { %570 = vmatprep.subr.mxu1 %v620_v30 }
 0x11b   :  { %571 = vmatpush3.xpose.msk.msra.mxu1 %vm276_vm3, %v265_v0 }
 0x11c   :  { %572 = vmatprep.subr.mxu1 %v620_v30 }
 0x11f   :  { %573 = vmatpush3.xpose.msk.msra.mxu1 %vm276_vm3, %v264_v1 }
 0x120   :  { %574 = vmatprep.subr.mxu1 %v620_v30 }
 0x123   :  { %575 = vmatpush3.xpose.msk.msra.mxu1 %vm276_vm3, %v263_v4 }
 0x124   :  { %576 = vmatprep.subr.mxu1 %v620_v30 }
 0x127   :  { %577 = vmatpush3.xpose.msk.msra.mxu1 %vm276_vm3, %v262_v5 }
 0x128   :  { %578 = vmatprep.subr.mxu1 %v620_v30 }
 0x12b   :  { %579 = vmatpush3.xpose.msk.msra.mxu1 %vm276_vm3, %v261_v8 }
 0x12c   :  { %580 = vmatprep.subr.mxu1 %v620_v30 }
 0x12f   :  { %581 = vmatpush3.xpose.msk.msra.mxu1 %vm276_vm3, %v260_v9 }
 0x130   :  { %582 = vmatprep.subr.mxu1 %v620_v30 }
 0x133   :  { %583 = vmatpush3.xpose.msk.msra.mxu1 %vm276_vm3, %v259_v12 }
 0x134   :  { %584 = vmatprep.subr.mxu1 %v620_v30 }
 0x137   :  { %585 = vmatpush3.xpose.msk.msra.mxu1 %vm276_vm3, %v258_v13 }
 0x138   :  { %586 = vmatprep.subr.mxu1 %v620_v30 }
 0x13b   :  { %587 = vmatpush3.xpose.msk.msra.mxu1 %vm276_vm3, %v257_v15 }
 0x13e   :  { %589 = vmatmul.mubr.msk.f32.vlgmr.msra.gmra.mxu1 %vm276_vm3, %v273_v16 }
 0x1fe   :  { %v394_v18 = vpop.f32.mrf.mxu1 }
 0x1ff   :  { %v395_v19 = vadd.f32 %v394_v18, %v275_v17 }
 0x200   :  { %v590_v20 = vpop.f32.mrf.mxu1 }
 0x201   :  { %v398_v21 = vand.u32 2147483647, %v395_v19  ;;  %vm402_vm4 = vcmp.ge.f32.partialorder %v395_v19, 0.0 }
 0x203   :  { %v399_v22 = vsub.f32 0.0, %v398_v21 }
 0x205   :  { %v400_v23 = vmul.f32 1.442695, %v399_v22 }
 0x207   :  { %594 = vpow2.f32 %v400_v23 }
 0x214   :  { %v595_v24 = vpop.eup %594 }
 0x215   :  { %v404_v25 = vadd.f32 1.0, %v595_v24  ;;  %v403_v27 = vsel %vm402_vm4, 1.0, %v595_v24 }
 0x217   :  { %596 = vrcp.f32 %v404_v25 }
 0x224   :  { %v597_v26 = vpop.eup %596 }
 0x225   :  { %v406_v28 = vmul.f32 %v597_v26, %v403_v27 }
 0x227   :  { %407 = vst [vmem:[#allocation3] sm:$0x1] %v406_v28 }
 0x228   :  { %609 = shalt.err (!%p606_p4)
}
 0x229   :  { %417 = dma.vmem_to_hbm [thread:$0]  %s415_s6, 16, %s819_s5, [#allocation4]  }
 0x22a   :  { %618 = dma.done.wait [#allocation4], 16  }
 0x22b   :  { %619 = vsyncadd [#allocation4], 4294967280 }
 0x22c   :  { %421 = vsyncpa [#allocation4], 1 }

</bundles_post_ra>
